<compile_context>
chip_gen: v6e
topology: v6e:2x2x1
jax: 0.10.0
libtpu: 0.0.40
codegen_flags: <defaults>
</compile_context>

<pallas_src>
from functools import partial

import jax
import jax.numpy as jnp
from jax.experimental import pallas as pl
from jax.experimental.pallas import tpu as pltpu

BN_EPS = 1e-5
_VMEM_LIMIT = 32 * 1024 * 1024   # explicit scoped-VMEM budget, safe on v5e/v6e/v7x


def _subpixel_conv(x_ref, xh_ref, w_ref, *, shifts, cin, tile_m):
    """Sub-pixel transposed-conv GEMM for one M tile -> (4*Cout, tile_m) f32.

    x_ref : (Cin, tile_m)      padded-flat x1 tile (channels on sublanes, pixels on lanes)
    xh_ref: (Cin, HALO)        halo lanes immediately following the tile
    w_ref : (4*Cout, T*T*Cin)  phase-major sub-pixel weight matrix (f32)

    The T*T tap views are static lane-offset slices of [tile | halo]; the tap gather
    happens in-kernel, so no T*T-inflated im2col is ever materialized in HBM.
    """
    xcat = jnp.concatenate(
        [x_ref[...].astype(jnp.float32), xh_ref[...].astype(jnp.float32)], axis=1)
    w = w_ref[...]
    acc = None
    for t, s in enumerate(shifts):
        part = jnp.dot(w[:, t * cin:(t + 1) * cin], xcat[:, s:s + tile_m],
                       preferred_element_type=jnp.float32)
        acc = part if acc is None else acc + part
    return acc                                                    # (4*Cout, tile_m) f32


def _bn_stats_kernel(x_ref, xh_ref, mask_ref, w_ref, s1_ref, s2_ref, *,
                     shifts, cin, tile_m, cout):
    """Pass 1: accumulate per-channel sum / sum-of-squares of the conv output."""
    @pl.when(pl.program_id(0) == 0)
    def _init():
        s1_ref[...] = jnp.zeros_like(s1_ref)
        s2_ref[...] = jnp.zeros_like(s2_ref)

    conv = _subpixel_conv(x_ref, xh_ref, w_ref, shifts=shifts, cin=cin, tile_m=tile_m)
    # mask is 1.0 on real output pixels, 0.0 on layout padding / tile tail
    cm = conv * mask_ref[...].astype(jnp.float32)
    cm3 = cm.reshape(4, cout, tile_m)
    s1 = jnp.sum(jnp.sum(cm3, axis=2, keepdims=True), axis=0, keepdims=True)
    s2 = jnp.sum(jnp.sum(cm3 * cm3, axis=2, keepdims=True), axis=0, keepdims=True)
    s1_ref[...] += s1.reshape(cout, 1)
    s2_ref[...] += s2.reshape(cout, 1)


def _bn_apply_kernel(x_ref, xh_ref, w_ref, scale_ref, shift_ref, o_ref, *,
                     shifts, cin, tile_m, cout):
    """Pass 2: recompute the cheap conv GEMM, apply folded BN + ReLU."""
    conv = _subpixel_conv(x_ref, xh_ref, w_ref, shifts=shifts, cin=cin, tile_m=tile_m)
    y = conv.reshape(4, cout, tile_m) * scale_ref[...][None] + shift_ref[...][None]
    y = jnp.maximum(y, 0.0)
    o_ref[...] = y.reshape(4 * cout, tile_m).astype(o_ref.dtype)


@partial(jax.jit, static_argnames=("kernel", "io_dtype", "tile_m"))
def deconv_block_sum_forward(x1, x2, weight, gamma, beta, *, kernel,
                             io_dtype=jnp.bfloat16, tile_m=None):
    """x1: (N, Cin, H, W); x2: (N, Cout, h2, w2); weight: (Cin, Cout, K, K)."""
    N, Cin, H, W = x1.shape
    K = kernel
    assert K % 2 == 1, "module uses padding=K//2 with output_padding=1 (odd K)"
    pad = K // 2
    Cout = weight.shape[1]
    Ho, Wo = 2 * H, 2 * W                       # (H-1)*2 - 2*(K//2) + K + 1 == 2H

    # ---- stride^2 sub-pixel decomposition bookkeeping (all static) ------------
    taps = sorted({(pr + pad - kh) // 2 for pr in (0, 1) for kh in range(K)
                   if (pr + pad - kh) % 2 == 0})
    T = len(taps)
    tap_of = {d: t for t, d in enumerate(taps)}
    lo, hi = -min(taps), max(taps)
    Hp, Wp = H + lo + hi, W + lo + hi
    MB = N * Hp * Wp                            # padded-flat "base" pixel count
    # lane shift of each tap within the padded-flat layout
    shifts = tuple((lo + di) * Wp + (lo + dj) for di in taps for dj in taps)
    halo = max(128, ((max(shifts) + 127) // 128) * 128)

    if tile_m is None:
        tile_m = 4096
    tile_m = max(halo, ((tile_m + halo - 1) // halo) * halo)   # multiple of halo & 128
    n_tiles = (MB + tile_m - 1) // tile_m
    m_pad = n_tiles * tile_m
    isz = jnp.dtype(io_dtype).itemsize

    # ---- one cheap XLA pre-pass: pad + channel-major + cast (no 4x im2col) ----
    xp = jnp.pad(x1.astype(io_dtype), ((0, 0), (0, 0), (lo, hi), (lo, hi)))
    xflat = xp.transpose(1, 0, 2, 3).reshape(Cin, MB)
    xflat = jnp.pad(xflat, ((0, 0), (0, m_pad + halo - MB)))

    # validity mask over the base domain (pad rows/cols and tile tail are 0)
    mask = jnp.zeros((N, Hp, Wp), io_dtype).at[:, :H, :W].set(1.0)
    mask = jnp.pad(mask.reshape(1, MB), ((0, 0), (0, m_pad - MB)))

    # phase-major sub-pixel weight matrix: (4*Cout, T*T*Cin), f32 (tiny)
    wt = jnp.zeros((4 * Cout, T * T * Cin), jnp.float32)
    for pr in (0, 1):
        for kh in range(K):
            if (pr + pad - kh) % 2:
                continue
            di = (pr + pad - kh) // 2
            for pc in (0, 1):
                for kw in range(K):
                    if (pc + pad - kw) % 2:
                        continue
                    dj = (pc + pad - kw) // 2
                    r0 = (pr * 2 + pc) * Cout
                    c0 = (tap_of[di] * T + tap_of[dj]) * Cin
                    wt = wt.at[r0:r0 + Cout, c0:c0 + Cin].set(weight[:, :, kh, kw].T)

    # ---- BlockSpecs shared by both passes -------------------------------------
    hb = tile_m // halo
    x_spec = pl.BlockSpec((Cin, tile_m), lambda i: (0, i))
    xh_spec = pl.BlockSpec((Cin, halo), lambda i: (0, (i + 1) * hb))
    w_spec = pl.BlockSpec((4 * Cout, T * T * Cin), lambda i: (0, 0))
    m_spec = pl.BlockSpec((1, tile_m), lambda i: (0, i))
    vec_spec = pl.BlockSpec((Cout, 1), lambda i: (0, 0))

    gemm_flops = 2 * (4 * Cout) * (T * T * Cin) * m_pad
    x_bytes = Cin * (m_pad + n_tiles * halo) * isz + (4 * Cout) * (T * T * Cin) * 4
    kern_kw = dict(shifts=shifts, cin=Cin, tile_m=tile_m, cout=Cout)

    # ---- pass 1: BN batch statistics (sequential M axis, resident accumulators)
    s1, s2 = pl.pallas_call(
        partial(_bn_stats_kernel, **kern_kw),
        grid=(n_tiles,),
        in_specs=[x_spec, xh_spec, m_spec, w_spec],
        out_specs=(vec_spec, vec_spec),
        out_shape=(jax.ShapeDtypeStruct((Cout, 1), jnp.float32),
                   jax.ShapeDtypeStruct((Cout, 1), jnp.float32)),
        compiler_params=pltpu.CompilerParams(
            dimension_semantics=("arbitrary",), vmem_limit_bytes=_VMEM_LIMIT),
        cost_estimate=pl.CostEstimate(
            flops=gemm_flops + 4 * (4 * Cout) * m_pad, transcendentals=0,
            bytes_accessed=x_bytes + m_pad * isz + 2 * Cout * 4),
    )(xflat, xflat, mask, wt)

    # ---- fold BN into per-channel scale/shift (tiny, plain XLA) ---------------
    # TODO(synk): single-pass var (E[x^2]-mean^2, clamped) is slightly less stable
    # than two-pass Welford; fine with f32 accumulation at realistic sizes.
    cnt = float(4 * N * H * W)
    mean = s1 / cnt
    var = jnp.maximum(s2 / cnt - mean * mean, 0.0)
    inv = jax.lax.rsqrt(var + BN_EPS)
    scale = inv * gamma.reshape(Cout, 1).astype(jnp.float32)
    shift = beta.reshape(Cout, 1).astype(jnp.float32) - mean * scale

    # ---- pass 2: recompute conv, apply folded BN + ReLU ("parallel" M axis) ---
    out2d = pl.pallas_call(
        partial(_bn_apply_kernel, **kern_kw),
        grid=(n_tiles,),
        in_specs=[x_spec, xh_spec, w_spec, vec_spec, vec_spec],
        out_specs=pl.BlockSpec((4 * Cout, tile_m), lambda i: (0, i)),
        out_shape=jax.ShapeDtypeStruct((4 * Cout, m_pad), io_dtype),
        compiler_params=pltpu.CompilerParams(
            dimension_semantics=("parallel",), vmem_limit_bytes=_VMEM_LIMIT),
        cost_estimate=pl.CostEstimate(
            flops=gemm_flops + 3 * (4 * Cout) * m_pad, transcendentals=0,
            bytes_accessed=x_bytes + 2 * Cout * 4 + (4 * Cout) * m_pad * isz),
    )(xflat, xflat, wt, scale, shift)

    # ---- skip-add + final ReLU fused with depth-to-space in one XLA output pass
    off = Ho - x2.shape[2]
    assert off % 2 == 0, "F.pad offset must be even to reproduce the module exactly"
    p2 = off // 2
    x2p = jnp.pad(x2.astype(jnp.float32), ((0, 0), (0, 0), (p2, p2), (p2, p2)))
    assert x2p.shape == (N, Cout, Ho, Wo), x2p.shape
    y1 = (out2d[:, :MB].astype(jnp.float32)
          .reshape(2, 2, Cout, N, Hp, Wp)[:, :, :, :, :H, :W]    # (pr,pc,co,n,i,j)
          .transpose(3, 2, 4, 0, 5, 1)                           # (n,co,i,pr,j,pc)
          .reshape(N, Cout, Ho, Wo))
    return jnp.maximum(y1 + x2p, 0.0)


def reference_forward(x1, x2, w, gamma, beta, *, kernel, eps=BN_EPS):
    """Pure-JAX reference straight from the PyTorch definitions."""
    N, Cin, H, W = x1.shape
    K = kernel
    pad = K // 2
    Cout = w.shape[1]
    Ho = (H - 1) * 2 - 2 * pad + K + 1
    Wo = (W - 1) * 2 - 2 * pad + K + 1
    big_h = (H - 1) * 2 + K
    big_w = (W - 1) * 2 + K
    out = jnp.zeros((N, Cout, big_h, big_w), jnp.float32)
    for kh in range(K):
        for kw in range(K):
            contrib = jnp.einsum('nihw,io->nohw', x1, w[:, :, kh, kw],
                                 precision=jax.lax.Precision.HIGHEST)
            out = out.at[:, :,
                         kh:kh + (H - 1) * 2 + 1:2,
                         kw:kw + (W - 1) * 2 + 1:2].add(contrib)
    conv = out[:, :, pad:pad + Ho, pad:pad + Wo]
    mean = conv.mean(axis=(0, 2, 3), keepdims=True)
    var = jnp.mean(jnp.square(conv - mean), axis=(0, 2, 3), keepdims=True)
    y = (conv - mean) * jax.lax.rsqrt(var + eps)
    y = y * gamma.reshape(1, Cout, 1, 1) + beta.reshape(1, Cout, 1, 1)
    y = jnp.maximum(y, 0.0)
    off = y.shape[2] - x2.shape[2]
    p2 = off // 2
    x2p = jnp.pad(x2, ((0, 0), (0, 0), (p2, p2), (p2, p2)))
    return jnp.maximum(y + x2p, 0.0)


if __name__ == "__main__":
    # Shapes consistent with the module: in_size=4, out_size=8, kernel=3.
    N, Cin, Cout, H, W, K = 2, 4, 8, 16, 16, 3

    key = jax.random.PRNGKey(0)
    k1, k2, k3, k4, k5 = jax.random.split(key, 5)
    x1 = jax.random.normal(k1, (N, Cin, H, W), dtype=jnp.float32)
    # skip input: out_size channels, spatial 2 smaller than the deconv output so
    # the F.pad path (offset//2 = 1 per side) is exercised.
    x2 = jax.random.normal(k2, (N, Cout, 2 * H - 2, 2 * W - 2), dtype=jnp.float32)
    # ConvTranspose2d weight: (in_channels, out_channels, K, K), bias=False
    weight = 0.1 * jax.random.normal(k3, (Cin, Cout, K, K), dtype=jnp.float32)
    # BatchNorm2d affine params (defaults gamma=1, beta=0; perturbed to test path)
    gamma = 1.0 + 0.1 * jax.random.normal(k4, (Cout,), dtype=jnp.float32)
    beta = 0.1 * jax.random.normal(k5, (Cout,), dtype=jnp.float32)

    ref = reference_forward(x1, x2, weight, gamma, beta, kernel=K)

    # bf16 storage (default), small tile so the multi-tile grid / halo / stats
    # accumulation paths are genuinely exercised at this test size.
    out = jax.block_until_ready(
        deconv_block_sum_forward(x1, x2, weight, gamma, beta, kernel=K, tile_m=256))
    assert out.shape == (N, Cout, 2 * H, 2 * W), out.shape
    err_bf16 = float(jnp.max(jnp.abs(out - ref)))
    assert err_bf16 < 6e-2, f"bf16 path max abs error {err_bf16}"

    # f32 storage path, tight tolerance against the reference.
    out32 = jax.block_until_ready(
        deconv_block_sum_forward(x1, x2, weight, gamma, beta, kernel=K,
                                 io_dtype=jnp.float32, tile_m=256))
    err_f32 = float(jnp.max(jnp.abs(out32 - ref)))
    assert err_f32 < 1e-3, f"f32 path max abs error {err_f32}"

    # default (large) tile: single-tile path.
    out_d = jax.block_until_ready(
        deconv_block_sum_forward(x1, x2, weight, gamma, beta, kernel=K))
    err_d = float(jnp.max(jnp.abs(out_d - ref)))
    assert err_d < 6e-2, f"default-tile max abs error {err_d}"

    print("KERNEL_OK")
</pallas_src>

<mosaic_0001>
module attributes {stable_mosaic.version = 11 : i64} {
  func.func @_bn_stats_kernel(%arg0: i32, %arg1: memref<4x256xbf16, #tpu.memory_space<vmem>>, %arg2: memref<4x128xbf16, #tpu.memory_space<vmem>>, %arg3: memref<1x256xbf16, #tpu.memory_space<vmem>>, %arg4: memref<32x16xf32, #tpu.memory_space<vmem>>, %arg5: memref<8x1xf32, #tpu.memory_space<vmem>>, %arg6: memref<8x1xf32, #tpu.memory_space<vmem>>) attributes {dimension_semantics = [#tpu.dimension_semantics<arbitrary>], iteration_bounds = array<i64: 3>, scalar_prefetch = 0 : i64, scratch_operands = 0 : i64, tpu.core_type = #tpu.core_type<tc>, window_params = [{transform_indices = @transform_0, window_bounds = array<i64: 4, 256>}, {transform_indices = @transform_1, window_bounds = array<i64: 4, 128>}, {transform_indices = @transform_2, window_bounds = array<i64: 1, 256>}, {pipeline_mode = #tpu.pipeline_mode<synchronous>, transform_indices = @transform_3, window_bounds = array<i64: 32, 16>}, {pipeline_mode = #tpu.pipeline_mode<synchronous>, transform_indices = @transform_4, window_bounds = array<i64: 8, 1>}, {pipeline_mode = #tpu.pipeline_mode<synchronous>, transform_indices = @transform_5, window_bounds = array<i64: 8, 1>}]} {
    %c0_i32 = arith.constant 0 : i32
    %0 = arith.cmpi eq, %arg0, %c0_i32 : i32
    %1 = arith.extui %0 : i1 to i32
    %c0_i32_0 = arith.constant 0 : i32
    %2 = arith.cmpi ne, %1, %c0_i32_0 : i32
    scf.if %2 {
      %cst_23 = arith.constant 0.000000e+00 : f32
      %46 = vector.broadcast %cst_23 : f32 to vector<8x1xf32>
      %c0_24 = arith.constant 0 : index
      %c0_25 = arith.constant 0 : index
      %47 = vector.load %arg5[%c0_24, %c0_25] : memref<8x1xf32, #tpu.memory_space<vmem>>, vector<8x1xf32>
      tpu.vector_store %arg5[%c0_24, %c0_25], %46 {strides = array<i32>} : memref<8x1xf32, #tpu.memory_space<vmem>>, vector<8x1xf32>,
      %cst_26 = arith.constant 0.000000e+00 : f32
      %48 = vector.broadcast %cst_26 : f32 to vector<8x1xf32>
      %c0_27 = arith.constant 0 : index
      %c0_28 = arith.constant 0 : index
      %49 = vector.load %arg6[%c0_27, %c0_28] : memref<8x1xf32, #tpu.memory_space<vmem>>, vector<8x1xf32>
      tpu.vector_store %arg6[%c0_27, %c0_28], %48 {strides = array<i32>} : memref<8x1xf32, #tpu.memory_space<vmem>>, vector<8x1xf32>,
    } else {
    }
    %c0 = arith.constant 0 : index
    %c0_1 = arith.constant 0 : index
    %3 = vector.load %arg1[%c0, %c0_1] : memref<4x256xbf16, #tpu.memory_space<vmem>>, vector<4x256xbf16>
    %4 = arith.extf %3 : vector<4x256xbf16> to vector<4x256xf32>
    %c0_2 = arith.constant 0 : index
    %c0_3 = arith.constant 0 : index
    %5 = vector.load %arg2[%c0_2, %c0_3] : memref<4x128xbf16, #tpu.memory_space<vmem>>, vector<4x128xbf16>
    %6 = arith.extf %5 : vector<4x128xbf16> to vector<4x128xf32>
    %7 = tpu.concatenate %4, %6 in 1 : vector<4x256xf32>, vector<4x128xf32> -> vector<4x384xf32>
    %c0_4 = arith.constant 0 : index
    %c0_5 = arith.constant 0 : index
    %8 = vector.load %arg4[%c0_4, %c0_5] : memref<32x16xf32, #tpu.memory_space<vmem>>, vector<32x16xf32>
    %9 = vector.extract_strided_slice %8 {offsets = [0, 0], sizes = [32, 4], strides = [1, 1]} : vector<32x16xf32> to vector<32x4xf32>
    %10 = vector.extract_strided_slice %7 {offsets = [0, 0], sizes = [4, 256], strides = [1, 1]} : vector<4x384xf32> to vector<4x256xf32>
    %cst = arith.constant dense<0.000000e+00> : vector<32x256xf32>
    %11 = tpu.matmul %9, %10, %cst {dimension_numbers = #tpu.dot_dimension_numbers<[1], [0], [0], [1], [0, 0, 1, 1], [], []>} : vector<32x4xf32>, vector<4x256xf32>, vector<32x256xf32> -> vector<32x256xf32>
    %12 = vector.extract_strided_slice %8 {offsets = [0, 4], sizes = [32, 4], strides = [1, 1]} : vector<32x16xf32> to vector<32x4xf32>
    %13 = vector.extract_strided_slice %7 {offsets = [0, 1], sizes = [4, 256], strides = [1, 1]} : vector<4x384xf32> to vector<4x256xf32>
    %cst_6 = arith.constant dense<0.000000e+00> : vector<32x256xf32>
    %14 = tpu.matmul %12, %13, %cst_6 {dimension_numbers = #tpu.dot_dimension_numbers<[1], [0], [0], [1], [0, 0, 1, 1], [], []>} : vector<32x4xf32>, vector<4x256xf32>, vector<32x256xf32> -> vector<32x256xf32>
    %15 = arith.addf %11, %14 : vector<32x256xf32>
    %16 = vector.extract_strided_slice %8 {offsets = [0, 8], sizes = [32, 4], strides = [1, 1]} : vector<32x16xf32> to vector<32x4xf32>
    %17 = vector.extract_strided_slice %7 {offsets = [0, 17], sizes = [4, 256], strides = [1, 1]} : vector<4x384xf32> to vector<4x256xf32>
    %cst_7 = arith.constant dense<0.000000e+00> : vector<32x256xf32>
    %18 = tpu.matmul %16, %17, %cst_7 {dimension_numbers = #tpu.dot_dimension_numbers<[1], [0], [0], [1], [0, 0, 1, 1], [], []>} : vector<32x4xf32>, vector<4x256xf32>, vector<32x256xf32> -> vector<32x256xf32>
    %19 = arith.addf %15, %18 : vector<32x256xf32>
    %20 = vector.extract_strided_slice %8 {offsets = [0, 12], sizes = [32, 4], strides = [1, 1]} : vector<32x16xf32> to vector<32x4xf32>
    %21 = vector.extract_strided_slice %7 {offsets = [0, 18], sizes = [4, 256], strides = [1, 1]} : vector<4x384xf32> to vector<4x256xf32>
    %cst_8 = arith.constant dense<0.000000e+00> : vector<32x256xf32>
    %22 = tpu.matmul %20, %21, %cst_8 {dimension_numbers = #tpu.dot_dimension_numbers<[1], [0], [0], [1], [0, 0, 1, 1], [], []>} : vector<32x4xf32>, vector<4x256xf32>, vector<32x256xf32> -> vector<32x256xf32>
    %23 = arith.addf %19, %22 : vector<32x256xf32>
    %c0_9 = arith.constant 0 : index
    %c0_10 = arith.constant 0 : index
    %24 = vector.load %arg3[%c0_9, %c0_10] : memref<1x256xbf16, #tpu.memory_space<vmem>>, vector<1x256xbf16>
    %25 = arith.extf %24 : vector<1x256xbf16> to vector<1x256xf32>
    %26 = vector.broadcast %25 : vector<1x256xf32> to vector<32x256xf32>
    %27 = arith.mulf %23, %26 : vector<32x256xf32>
    %28 = vector.shape_cast %27 : vector<32x256xf32> to vector<4x8x256xf32>
    %cst_11 = arith.constant dense<0.000000e+00> : vector<4x8xf32>
    %29 = vector.multi_reduction <add>, %28, %cst_11 [2] : vector<4x8x256xf32> to vector<4x8xf32>
    %30 = vector.shape_cast %29 : vector<4x8xf32> to vector<4x8x1xf32>
    %cst_12 = arith.constant dense<0.000000e+00> : vector<8x1xf32>
    %31 = vector.multi_reduction <add>, %30, %cst_12 [0] : vector<4x8x1xf32> to vector<8x1xf32>
    %32 = vector.shape_cast %31 : vector<8x1xf32> to vector<1x8x1xf32>
    %33 = arith.mulf %28, %28 : vector<4x8x256xf32>
    %cst_13 = arith.constant dense<0.000000e+00> : vector<4x8xf32>
    %34 = vector.multi_reduction <add>, %33, %cst_13 [2] : vector<4x8x256xf32> to vector<4x8xf32>
    %35 = vector.shape_cast %34 : vector<4x8xf32> to vector<4x8x1xf32>
    %cst_14 = arith.constant dense<0.000000e+00> : vector<8x1xf32>
    %36 = vector.multi_reduction <add>, %35, %cst_14 [0] : vector<4x8x1xf32> to vector<8x1xf32>
    %37 = vector.shape_cast %36 : vector<8x1xf32> to vector<1x8x1xf32>
    %c0_15 = arith.constant 0 : index
    %c0_16 = arith.constant 0 : index
    %38 = vector.load %arg5[%c0_15, %c0_16] : memref<8x1xf32, #tpu.memory_space<vmem>>, vector<8x1xf32>
    %39 = vector.shape_cast %32 : vector<1x8x1xf32> to vector<8x1xf32>
    %40 = arith.addf %38, %39 : vector<8x1xf32>
    %c0_17 = arith.constant 0 : index
    %c0_18 = arith.constant 0 : index
    %41 = vector.load %arg5[%c0_17, %c0_18] : memref<8x1xf32, #tpu.memory_space<vmem>>, vector<8x1xf32>
    tpu.vector_store %arg5[%c0_17, %c0_18], %40 {strides = array<i32>} : memref<8x1xf32, #tpu.memory_space<vmem>>, vector<8x1xf32>,
    %c0_19 = arith.constant 0 : index
    %c0_20 = arith.constant 0 : index
    %42 = vector.load %arg6[%c0_19, %c0_20] : memref<8x1xf32, #tpu.memory_space<vmem>>, vector<8x1xf32>
    %43 = vector.shape_cast %37 : vector<1x8x1xf32> to vector<8x1xf32>
    %44 = arith.addf %42, %43 : vector<8x1xf32>
    %c0_21 = arith.constant 0 : index
    %c0_22 = arith.constant 0 : index
    %45 = vector.load %arg6[%c0_21, %c0_22] : memref<8x1xf32, #tpu.memory_space<vmem>>, vector<8x1xf32>
    tpu.vector_store %arg6[%c0_21, %c0_22], %44 {strides = array<i32>} : memref<8x1xf32, #tpu.memory_space<vmem>>, vector<8x1xf32>,
    return
  }
  func.func @transform_0(%arg0: i32) -> (i32, i32) {
    %c0_i32 = arith.constant 0 : i32
    %c0_i32_0 = arith.constant 0 : i32
    return %c0_i32, %arg0 : i32, i32
  }
  func.func @transform_1(%arg0: i32) -> (i32, i32) {
    %c1_i32 = arith.constant 1 : i32
    %0 = arith.addi %arg0, %c1_i32 : i32
    %c2_i32 = arith.constant 2 : i32
    %1 = arith.muli %0, %c2_i32 : i32
    %c0_i32 = arith.constant 0 : i32
    %c0_i32_0 = arith.constant 0 : i32
    return %c0_i32, %1 : i32, i32
  }
  func.func @transform_2(%arg0: i32) -> (i32, i32) {
    %c0_i32 = arith.constant 0 : i32
    %c0_i32_0 = arith.constant 0 : i32
    return %c0_i32, %arg0 : i32, i32
  }
  func.func @transform_3(%arg0: i32) -> (i32, i32) {
    %c0_i32 = arith.constant 0 : i32
    %c0_i32_0 = arith.constant 0 : i32
    %c0_i32_1 = arith.constant 0 : i32
    return %c0_i32, %c0_i32_0 : i32, i32
  }
  func.func @transform_4(%arg0: i32) -> (i32, i32) {
    %c0_i32 = arith.constant 0 : i32
    %c0_i32_0 = arith.constant 0 : i32
    %c0_i32_1 = arith.constant 0 : i32
    return %c0_i32, %c0_i32_0 : i32, i32
  }
  func.func @transform_5(%arg0: i32) -> (i32, i32) {
    %c0_i32 = arith.constant 0 : i32
    %c0_i32_0 = arith.constant 0 : i32
    %c0_i32_1 = arith.constant 0 : i32
    return %c0_i32, %c0_i32_0 : i32, i32
  }
}

module attributes {stable_mosaic.version = 11 : i64} {
  func.func @_bn_apply_kernel(%arg0: i32, %arg1: memref<4x256xbf16, #tpu.memory_space<vmem>>, %arg2: memref<4x128xbf16, #tpu.memory_space<vmem>>, %arg3: memref<32x16xf32, #tpu.memory_space<vmem>>, %arg4: memref<8x1xf32, #tpu.memory_space<vmem>>, %arg5: memref<8x1xf32, #tpu.memory_space<vmem>>, %arg6: memref<32x256xbf16, #tpu.memory_space<vmem>>) attributes {dimension_semantics = [#tpu.dimension_semantics<parallel>], iteration_bounds = array<i64: 3>, scalar_prefetch = 0 : i64, scratch_operands = 0 : i64, tpu.core_type = #tpu.core_type<tc>, window_params = [{transform_indices = @transform_0, window_bounds = array<i64: 4, 256>}, {transform_indices = @transform_1, window_bounds = array<i64: 4, 128>}, {pipeline_mode = #tpu.pipeline_mode<synchronous>, transform_indices = @transform_2, window_bounds = array<i64: 32, 16>}, {pipeline_mode = #tpu.pipeline_mode<synchronous>, transform_indices = @transform_3, window_bounds = array<i64: 8, 1>}, {pipeline_mode = #tpu.pipeline_mode<synchronous>, transform_indices = @transform_4, window_bounds = array<i64: 8, 1>}, {transform_indices = @transform_5, window_bounds = array<i64: 32, 256>}]} {
    %c0 = arith.constant 0 : index
    %c0_0 = arith.constant 0 : index
    %0 = vector.load %arg1[%c0, %c0_0] : memref<4x256xbf16, #tpu.memory_space<vmem>>, vector<4x256xbf16>
    %1 = arith.extf %0 : vector<4x256xbf16> to vector<4x256xf32>
    %c0_1 = arith.constant 0 : index
    %c0_2 = arith.constant 0 : index
    %2 = vector.load %arg2[%c0_1, %c0_2] : memref<4x128xbf16, #tpu.memory_space<vmem>>, vector<4x128xbf16>
    %3 = arith.extf %2 : vector<4x128xbf16> to vector<4x128xf32>
    %4 = tpu.concatenate %1, %3 in 1 : vector<4x256xf32>, vector<4x128xf32> -> vector<4x384xf32>
    %c0_3 = arith.constant 0 : index
    %c0_4 = arith.constant 0 : index
    %5 = vector.load %arg3[%c0_3, %c0_4] : memref<32x16xf32, #tpu.memory_space<vmem>>, vector<32x16xf32>
    %6 = vector.extract_strided_slice %5 {offsets = [0, 0], sizes = [32, 4], strides = [1, 1]} : vector<32x16xf32> to vector<32x4xf32>
    %7 = vector.extract_strided_slice %4 {offsets = [0, 0], sizes = [4, 256], strides = [1, 1]} : vector<4x384xf32> to vector<4x256xf32>
    %cst = arith.constant dense<0.000000e+00> : vector<32x256xf32>
    %8 = tpu.matmul %6, %7, %cst {dimension_numbers = #tpu.dot_dimension_numbers<[1], [0], [0], [1], [0, 0, 1, 1], [], []>} : vector<32x4xf32>, vector<4x256xf32>, vector<32x256xf32> -> vector<32x256xf32>
    %9 = vector.extract_strided_slice %5 {offsets = [0, 4], sizes = [32, 4], strides = [1, 1]} : vector<32x16xf32> to vector<32x4xf32>
    %10 = vector.extract_strided_slice %4 {offsets = [0, 1], sizes = [4, 256], strides = [1, 1]} : vector<4x384xf32> to vector<4x256xf32>
    %cst_5 = arith.constant dense<0.000000e+00> : vector<32x256xf32>
    %11 = tpu.matmul %9, %10, %cst_5 {dimension_numbers = #tpu.dot_dimension_numbers<[1], [0], [0], [1], [0, 0, 1, 1], [], []>} : vector<32x4xf32>, vector<4x256xf32>, vector<32x256xf32> -> vector<32x256xf32>
    %12 = arith.addf %8, %11 : vector<32x256xf32>
    %13 = vector.extract_strided_slice %5 {offsets = [0, 8], sizes = [32, 4], strides = [1, 1]} : vector<32x16xf32> to vector<32x4xf32>
    %14 = vector.extract_strided_slice %4 {offsets = [0, 17], sizes = [4, 256], strides = [1, 1]} : vector<4x384xf32> to vector<4x256xf32>
    %cst_6 = arith.constant dense<0.000000e+00> : vector<32x256xf32>
    %15 = tpu.matmul %13, %14, %cst_6 {dimension_numbers = #tpu.dot_dimension_numbers<[1], [0], [0], [1], [0, 0, 1, 1], [], []>} : vector<32x4xf32>, vector<4x256xf32>, vector<32x256xf32> -> vector<32x256xf32>
    %16 = arith.addf %12, %15 : vector<32x256xf32>
    %17 = vector.extract_strided_slice %5 {offsets = [0, 12], sizes = [32, 4], strides = [1, 1]} : vector<32x16xf32> to vector<32x4xf32>
    %18 = vector.extract_strided_slice %4 {offsets = [0, 18], sizes = [4, 256], strides = [1, 1]} : vector<4x384xf32> to vector<4x256xf32>
    %cst_7 = arith.constant dense<0.000000e+00> : vector<32x256xf32>
    %19 = tpu.matmul %17, %18, %cst_7 {dimension_numbers = #tpu.dot_dimension_numbers<[1], [0], [0], [1], [0, 0, 1, 1], [], []>} : vector<32x4xf32>, vector<4x256xf32>, vector<32x256xf32> -> vector<32x256xf32>
    %20 = arith.addf %16, %19 : vector<32x256xf32>
    %21 = vector.shape_cast %20 : vector<32x256xf32> to vector<4x8x256xf32>
    %c0_8 = arith.constant 0 : index
    %c0_9 = arith.constant 0 : index
    %22 = vector.load %arg4[%c0_8, %c0_9] : memref<8x1xf32, #tpu.memory_space<vmem>>, vector<8x1xf32>
    %23 = vector.shape_cast %22 : vector<8x1xf32> to vector<1x8x1xf32>
    %24 = vector.broadcast %23 : vector<1x8x1xf32> to vector<4x8x256xf32>
    %25 = arith.mulf %21, %24 : vector<4x8x256xf32>
    %c0_10 = arith.constant 0 : index
    %c0_11 = arith.constant 0 : index
    %26 = vector.load %arg5[%c0_10, %c0_11] : memref<8x1xf32, #tpu.memory_space<vmem>>, vector<8x1xf32>
    %27 = vector.shape_cast %26 : vector<8x1xf32> to vector<1x8x1xf32>
    %28 = vector.broadcast %27 : vector<1x8x1xf32> to vector<4x8x256xf32>
    %29 = arith.addf %25, %28 : vector<4x8x256xf32>
    %cst_12 = arith.constant 0.000000e+00 : f32
    %30 = vector.broadcast %cst_12 : f32 to vector<4x8x256xf32>
    %31 = arith.maximumf %29, %30 : vector<4x8x256xf32>
    %32 = vector.shape_cast %31 : vector<4x8x256xf32> to vector<32x256xf32>
    %33 = arith.truncf %32 : vector<32x256xf32> to vector<32x256xbf16>
    %c0_13 = arith.constant 0 : index
    %c0_14 = arith.constant 0 : index
    %34 = vector.load %arg6[%c0_13, %c0_14] : memref<32x256xbf16, #tpu.memory_space<vmem>>, vector<32x256xbf16>
    tpu.vector_store %arg6[%c0_13, %c0_14], %33 {strides = array<i32>} : memref<32x256xbf16, #tpu.memory_space<vmem>>, vector<32x256xbf16>,
    return
  }
  func.func @transform_0(%arg0: i32) -> (i32, i32) {
    %c0_i32 = arith.constant 0 : i32
    %c0_i32_0 = arith.constant 0 : i32
    return %c0_i32, %arg0 : i32, i32
  }
  func.func @transform_1(%arg0: i32) -> (i32, i32) {
    %c1_i32 = arith.constant 1 : i32
    %0 = arith.addi %arg0, %c1_i32 : i32
    %c2_i32 = arith.constant 2 : i32
    %1 = arith.muli %0, %c2_i32 : i32
    %c0_i32 = arith.constant 0 : i32
    %c0_i32_0 = arith.constant 0 : i32
    return %c0_i32, %1 : i32, i32
  }
  func.func @transform_2(%arg0: i32) -> (i32, i32) {
    %c0_i32 = arith.constant 0 : i32
    %c0_i32_0 = arith.constant 0 : i32
    %c0_i32_1 = arith.constant 0 : i32
    return %c0_i32, %c0_i32_0 : i32, i32
  }
  func.func @transform_3(%arg0: i32) -> (i32, i32) {
    %c0_i32 = arith.constant 0 : i32
    %c0_i32_0 = arith.constant 0 : i32
    %c0_i32_1 = arith.constant 0 : i32
    return %c0_i32, %c0_i32_0 : i32, i32
  }
  func.func @transform_4(%arg0: i32) -> (i32, i32) {
    %c0_i32 = arith.constant 0 : i32
    %c0_i32_0 = arith.constant 0 : i32
    %c0_i32_1 = arith.constant 0 : i32
    return %c0_i32, %c0_i32_0 : i32, i32
  }
  func.func @transform_5(%arg0: i32) -> (i32, i32) {
    %c0_i32 = arith.constant 0 : i32
    %c0_i32_0 = arith.constant 0 : i32
    return %c0_i32, %arg0 : i32, i32
  }
}

</mosaic_0001>

<bundles_post_ra>
// kernel: deconv_block_sum_forward.2
= control target key start
LH: loop header
LB: loop body
LE: loop exit
PB: predicated region body
PF: predicated region fallthrough
CT: control target
= control target key end

     0   :  { %s1025_s18 = smov 0   ;;  %s1123_s0 = inlined_call_operand.vmem [shape: bf16[4,896], index: 0, kind: input, shape index: {}, may-alias: {0,1}]   ;;  %s1124_s1 = inlined_call_operand.vmem [shape: bf16[4,896], index: 1, kind: input, shape index: {}, may-alias: {0,1}]   ;;  %s1125_s2 = inlined_call_operand.vmem [shape: bf16[1,768], index: 2, kind: input, shape index: {}]   ;;  %s1126_s3 = inlined_call_operand.vmem [shape: f32[32,16], index: 3, kind: input, shape index: {}]   ;;  %s1127_s4 = inlined_call_operand.vmem [shape: f32[8,1], index: 4, kind: output, shape index: {0}]   ;;  %s1128_s5 = inlined_call_operand.vmem [shape: f32[8,1], index: 5, kind: output, shape index: {1}]  }
   0x1 LB: > { %s904_s19 = sadd.s32 4294967295, %s985_s18   ;;  %p909_p0 = scmp.ge.s32.totalorder %s985_s18, 1  ;;  %s985_s18 = sphi %s1025_s18, %s16_s18  }
   0x2   : > { %p216_p1 = scmp.lt.s32.totalorder %s985_s18, 4 }
   0x4   : > { %p217_p2 = pnand %p909_p0, %p216_p1 }
   0x5   : > { %s910_s20 = sshll.u32 (!%p217_p2), %s904_s19, 1  ;;  %p915_p6 = scmp.ne.s32.totalorder (!%p217_p2), %s904_s19, 0 }
   0x6   : > { %220 = sbr.rel (%p217_p2) target bundleno = 528 (0x210), region = 36  ;;  %p258_p3 = scmp.lt.s32.totalorder (!%p217_p2), %s910_s20, 6 }
   0x7   : > { %s947_s21 = sadd.s32 (!%p217_p2), 2, %s910_s20  ;;  %p276_p5 = scmp.lt.s32.totalorder (!%p217_p2), %s910_s20, 5 }
   0x8   : > { %p269_p4 = scmp.lt.s32.totalorder (!%p217_p2), %s947_s21, 6 }
   0xb   : > { %s259_s22 = scalar_select %p258_p3, %s910_s20, 6 }
   0xc   : > { %s1130_s21 = smov (!%p269_p4, %s947_s21), 6  ;;  %s1132_s20 = smov (!%p276_p5, %s910_s20), 5 }
   0xd   : > { %s911_s23 = sshll.u32 %s259_s22, 1  ;;  %s913_s27 = sshll.u32 %s1130_s21, 1 }
   0xe   : > { %s261_s26 = scalar_lea.vmem %s1123_s0, %s911_s23  ;;  %s272_s30 = scalar_lea.vmem %s1124_s1, %s913_s27 }
   0xf   : > { %s278_s8 = scalar_lea.vmem %s1125_s2, %s1132_s20  ;;  %283 = sbr.rel (%p915_p6) target bundleno = 22 (0x16), region = 40 }
  0x14   : > { %vm284_vm0 = vcmask 7168   ;;  %v987_v0 = vmov 0.0  }
  0x15   : > { %285 = vst.msk [vmem:[%s1127_s4] sm:$0xff] %vm284_vm0, %v987_v0  ;;  %286 = vst.msk [vmem:[%s1128_s5] sm:$0xff] %vm284_vm0, %v987_v0 }
  0x16 PF: > { %v287_v1 = vld [vmem:[%s261_s26] sm:$0xf]  ;;  %s988_s15 = smov 124   ;;  %vm328_vm1 = vcmask 1043456   ;;  %v294_v7 = vld [vmem:[%s1126_s3 + $0x8] sm:$0xff]  ;;  %v989_v8 = vmov 0.0   ;;  %v778_v49 = vlaneseq }
  0x17   : > { %v289_v2 = vld [vmem:[%s272_s30] sm:$0x3]  ;;  %v288_v4 = vunpack.c.l.bf16 %v287_v1  ;;  %397 = vmatprep.mubr.f32.mxu0 %v989_v8  ;;  %498 = vmatprep.mubr.f32.mxu1 %v989_v8  ;;  %vm319_vm2 = vcmask 31744   ;;  %s990_s19 = smov 127   ;;  %v296_v10 = vld [vmem:[%s1126_s3 + $0x18] sm:$0xff]  ;;  %v295_v11 = vld [vmem:[%s1126_s3 + $0x10] sm:$0xff] }
  0x18   : > { %v293_v3 = vld [vmem:[%s1126_s3] sm:$0xff]  ;;  %v290_v5 = vunpack.c.l.bf16 %v289_v2  ;;  %s991_s25 = smov 111   ;;  %s992_s26 = smov 120   ;;  %vm316_vm3 = vcmask 1039360   ;;  %vm537_vm4 = vcmask 908288   ;;  %vm663_vm5 = vcmask 900096  }
  0x19   : > { %301 = vrot.lane.b32.xlu1 %v293_v3, %s988_s15  ;;  %v292_v6 = vcombine.high %v288_v4, %v288_v4  ;;  %s993_s27 = smov 116   ;;  %s994_s28 = smov 110   ;;  %v779_v53 = vshrl.u32 %v778_v49, 7  ;;  %v775_v54 = vld [vmem:[%s278_s8] sm:$0x3]  ;;  %vm844_vm6 = vcmask 7168  }
  0x1a   : > { %v776_v58 = vunpack.c.l.bf16 %v775_v54 }
  0x1b   : > { %v964_v9 = vpack.i.bf16 %v290_v5, %v292_v6  ;;  %922 = vmatprep.subr.msk.mxu1 %vm328_vm1, %v292_v6  ;;  %v780_v59 = vsub.s32 0, %v779_v53  ;;  %v784_v60 = vsub.s32 2, %v779_v53 }
  0x1c   : > { %923 = vmatpush1.msk.msra.mxu1 %vm328_vm1, %v288_v4 }
  0x1d   : > { %303 = vrot.lane.b32.xlu1 %v294_v7, %s988_s15  ;;  %965 = vrot.lane.b32.xlu0 %v964_v9, %s990_s19  ;;  %v781_v0 = vrot.slane %v776_v58, %v780_v59  ;;  %v785_v2 = vrot.slane %v776_v58, %v784_v60 }
  0x1e   : > { %924 = vmatmul.mubr.msk.f32.vlgmr.msra.gmra.mxu1 %vm319_vm2, %v293_v3 }
  0x1f   : > { %504 = vmatprep.mubr.f32.mxu1 %v989_v8 }
  0x21   : > { %307 = vrot.lane.b32.xlu1 %v296_v10, %s988_s15  ;;  %310 = vrot.lane.b32.xlu0 %v288_v4, %s990_s19 }
  0x22   : > { %925 = vmatmul.mubr.msk.f32.gmra.mxu1 %vm319_vm2, %v294_v7 }
  0x23   : > { %510 = vmatprep.mubr.f32.mxu1 %v989_v8 }
  0x25   : > { %531 = vrot.lane.b32.xlu1 %v288_v4, %s991_s25  ;;  %305 = vrot.lane.b32.xlu0 %v295_v11, %s988_s15 }
  0x26   : > { %926 = vmatmul.mubr.msk.f32.gmra.mxu1 %vm319_vm2, %v295_v11 }
  0x27   : > { %516 = vmatprep.mubr.f32.mxu1 %v989_v8 }
  0x29   : > { %523 = vrot.lane.b32.xlu1 %v293_v3, %s992_s26  ;;  %970 = vrot.lane.b32.xlu0 %v964_v9, %s991_s25 }
  0x2a   : > { %927 = vmatmul.mubr.msk.f32.gmra.mxu1 %vm319_vm2, %v296_v10 }
  0x2b   : > { %742 = vmatprep.mubr.f32.mxu1 %v989_v8 }
  0x2d   : > { %649 = vrot.lane.b32.xlu1 %v293_v3, %s993_s27  ;;  %975 = vrot.lane.b32.xlu0 %v964_v9, %s994_s28 }
  0x31   : > { %651 = vrot.lane.b32.xlu1 %v294_v7, %s993_s27  ;;  %657 = vrot.lane.b32.xlu0 %v288_v4, %s994_s28 }
  0x35   : > { %653 = vrot.lane.b32.xlu1 %v295_v11, %s993_s27  ;;  %525 = vrot.lane.b32.xlu0 %v294_v7, %s992_s26 }
  0x39   : > { %655 = vrot.lane.b32.xlu1 %v296_v10, %s993_s27  ;;  %527 = vrot.lane.b32.xlu0 %v295_v11, %s992_s26 }
  0x3d   : > { %529 = vrot.lane.b32.xlu0 %v296_v10, %s992_s26 }
  0x8b   : > { %v302_v12 = vpop.permute.xlu1 %301 }
  0x8f   : > { %v304_v13 = vpop.permute.xlu1 %303  ;;  %v966_v14 = vpop.permute.xlu0 %965 }
  0x90   : > { %v968_v15 = vunpack.i.h.bf16 %v966_v14  ;;  %v967_v16 = vunpack.i.l.bf16 %v966_v14 }
  0x92   : > { %v318_v17 = vsel %vm316_vm3, %v967_v16, %v968_v15 }
  0x93   : > { %v308_v18 = vpop.permute.xlu1 %307  ;;  %v311_v19 = vpop.permute.xlu0 %310  ;;  %916 = vmatprep.subr.msk.mxu0 %vm328_vm1, %v318_v17 }
  0x94   : > { %v317_v20 = vsel %vm316_vm3, %v311_v19, %v967_v16 }
  0x95   : > { %917 = vmatpush1.msk.msra.mxu0 %vm328_vm1, %v317_v20 }
  0x96   : > { %918 = vmatmul.mubr.msk.f32.vlgmr.msra.gmra.mxu0 %vm319_vm2, %v302_v12 }
  0x97   : > { %v532_v21 = vpop.permute.xlu1 %531  ;;  %v306_v22 = vpop.permute.xlu0 %305  ;;  %403 = vmatprep.mubr.f32.mxu0 %v989_v8 }
  0x9a   : > { %919 = vmatmul.mubr.msk.f32.gmra.mxu0 %vm319_vm2, %v304_v13  ;;  %v795_v13 = vrot.slane %v785_v2, %v780_v59 }
  0x9b   : > { %v524_v23 = vpop.permute.xlu1 %523  ;;  %v971_v24 = vpop.permute.xlu0 %970  ;;  %409 = vmatprep.mubr.f32.mxu0 %v989_v8 }
  0x9c   : > { %v973_v25 = vunpack.i.h.bf16 %v971_v24  ;;  %v972_v26 = vunpack.i.l.bf16 %v971_v24 }
  0x9e   : > { %v538_v27 = vsel %vm537_vm4, %v532_v21, %v972_v26  ;;  %920 = vmatmul.mubr.msk.f32.gmra.mxu0 %vm319_vm2, %v306_v22  ;;  %v539_v28 = vsel %vm537_vm4, %v972_v26, %v973_v25 }
  0x9f   : > { %v976_v29 = vpop.permute.xlu0 %975  ;;  %928 = vmatprep.subr.msk.mxu0 %vm328_vm1, %v539_v28  ;;  %415 = vmatprep.mubr.f32.mxu0 %v989_v8  ;;  %v650_v30 = vpop.permute.xlu1 %649 }
  0xa0   : > { %v978_v31 = vunpack.i.h.bf16 %v976_v29  ;;  %v977_v32 = vunpack.i.l.bf16 %v976_v29  ;;  %929 = vmatpush1.msk.msra.mxu0 %vm328_vm1, %v538_v27 }
  0xa2   : > { %921 = vmatmul.mubr.msk.f32.gmra.mxu0 %vm319_vm2, %v308_v18  ;;  %v665_v33 = vsel %vm663_vm5, %v977_v32, %v978_v31 }
  0xa3   : > { %v658_v34 = vpop.permute.xlu0 %657  ;;  %934 = vmatprep.subr.msk.mxu1 %vm328_vm1, %v665_v33  ;;  %616 = vmatprep.mubr.f32.mxu0 %v989_v8  ;;  %v652_v35 = vpop.permute.xlu1 %651 }
  0xa4   : > { %v664_v36 = vsel %vm663_vm5, %v658_v34, %v977_v32 }
  0xa5   : > { %935 = vmatpush1.msk.msra.mxu1 %vm328_vm1, %v664_v36 }
  0xa6   : > { %930 = vmatmul.mubr.msk.f32.vlgmr.msra.gmra.mxu0 %vm319_vm2, %v524_v23  ;;  %936 = vmatmul.mubr.msk.f32.vlgmr.msra.gmra.mxu1 %vm319_vm2, %v650_v30 }
  0xa7   : > { %v526_v37 = vpop.permute.xlu0 %525  ;;  %622 = vmatprep.mubr.f32.mxu0 %v989_v8  ;;  %748 = vmatprep.mubr.f32.mxu1 %v989_v8  ;;  %v654_v38 = vpop.permute.xlu1 %653 }
  0xaa   : > { %931 = vmatmul.mubr.msk.f32.gmra.mxu0 %vm319_vm2, %v526_v37  ;;  %937 = vmatmul.mubr.msk.f32.gmra.mxu1 %vm319_vm2, %v652_v35 }
  0xab   : > { %v528_v39 = vpop.permute.xlu0 %527  ;;  %628 = vmatprep.mubr.f32.mxu0 %v989_v8  ;;  %754 = vmatprep.mubr.f32.mxu1 %v989_v8  ;;  %v656_v41 = vpop.permute.xlu1 %655 }
  0xae   : > { %932 = vmatmul.mubr.msk.f32.gmra.mxu0 %vm319_vm2, %v528_v39  ;;  %938 = vmatmul.mubr.msk.f32.gmra.mxu1 %vm319_vm2, %v654_v38 }
  0xaf   : > { %v530_v40 = vpop.permute.xlu0 %529  ;;  %634 = vmatprep.mubr.f32.mxu0 %v989_v8  ;;  %760 = vmatprep.mubr.f32.mxu1 %v989_v8  ;;  %v791_v8 = vrot.slane %v781_v0, %v780_v59 }
  0xb2   : > { %933 = vmatmul.mubr.msk.f32.gmra.mxu0 %vm319_vm2, %v530_v40  ;;  %939 = vmatmul.mubr.msk.f32.gmra.mxu1 %vm319_vm2, %v656_v41 }
  0xde   : > { %v500_v42 = vpop.f32.mrf.mxu1 }
  0xe0   : > { %v502_v43 = vpop.f32.mrf.mxu1 }
  0xe2   : > { %v506_v44 = vpop.f32.mrf.mxu1 }
  0xe4   : > { %v508_v45 = vpop.f32.mrf.mxu1 }
  0xe6   : > { %v512_v47 = vpop.f32.mrf.mxu1 }
  0xe8   : > { %v514_v51 = vpop.f32.mrf.mxu1 }
  0xea   : > { %v518_v56 = vpop.f32.mrf.mxu1 }
  0xec   : > { %v520_v62 = vpop.f32.mrf.mxu1 }
 0x156   : > { %v399_v46 = vpop.f32.mrf.mxu0 }
 0x157   : > { %v501_v1 = vadd.f32 %v500_v42, %v399_v46 }
 0x158   : > { %v401_v48 = vpop.f32.mrf.mxu0 }
 0x159   : > { %v503_v5 = vadd.f32 %v502_v43, %v401_v48 }
 0x15a   : > { %v405_v50 = vpop.f32.mrf.mxu0 }
 0x15b   : > { %v507_v10 = vadd.f32 %v506_v44, %v405_v50 }
 0x15c   : > { %v407_v52 = vpop.f32.mrf.mxu0 }
 0x15d   : > { %v509_v16 = vadd.f32 %v508_v45, %v407_v52 }
 0x15e   : > { %v411_v55 = vpop.f32.mrf.mxu0 }
 0x15f   : > { %v513_v19 = vadd.f32 %v512_v47, %v411_v55 }
 0x160   : > { %v413_v57 = vpop.f32.mrf.mxu0 }
 0x161   : > { %v515_v28 = vadd.f32 %v514_v51, %v413_v57 }
 0x162   : > { %v417_v61 = vpop.f32.mrf.mxu0 }
 0x163   : > { %v519_v32 = vadd.f32 %v518_v56, %v417_v61 }
 0x164   : > { %v419_v63 = vpop.f32.mrf.mxu0 }
 0x165   : > { %v521_v41 = vadd.f32 %v520_v62, %v419_v63 }
 0x166   : > { %v618_v3 = vpop.f32.mrf.mxu0  ;;  %v744_v4 = vpop.f32.mrf.mxu1 }
 0x167   : > { %v641_v6 = vadd.f32 %v618_v3, %v501_v1 }
 0x168   : > { %v620_v7 = vpop.f32.mrf.mxu0  ;;  %v746_v9 = vpop.f32.mrf.mxu1 }
 0x169   : > { %v642_v11 = vadd.f32 %v620_v7, %v503_v5  ;;  %v767_v12 = vadd.f32 %v744_v4, %v641_v6 }
 0x16a   : > { %v624_v14 = vpop.f32.mrf.mxu0  ;;  %v750_v15 = vpop.f32.mrf.mxu1 }
 0x16b   : > { %v643_v17 = vadd.f32 %v624_v14, %v507_v10  ;;  %v768_v18 = vadd.f32 %v746_v9, %v642_v11  ;;  %v796_v22 = vmul.f32 %v791_v8, %v767_v12 }
 0x16c   : > { %v626_v20 = vpop.f32.mrf.mxu0  ;;  %v752_v21 = vpop.f32.mrf.mxu1 }
 0x16d   : > { %v797_v23 = vmul.f32 %v795_v13, %v768_v18  ;;  %v644_v24 = vadd.f32 %v626_v20, %v509_v16  ;;  %v769_v25 = vadd.f32 %v750_v15, %v643_v17  ;;  %v819_v40 = vmul.f32 %v796_v22, %v796_v22  ;;  %v846_v18 = vld [vmem:[%s1128_s5] sm:$0xff] }
 0x16e   : > { %v630_v26 = vpop.f32.mrf.mxu0  ;;  %v756_v27 = vpop.f32.mrf.mxu1 }
 0x16f   : > { %v645_v29 = vadd.f32 %v630_v26, %v513_v19  ;;  %v770_v30 = vadd.f32 %v752_v21, %v644_v24  ;;  %v804_v31 = vadd.f32 %v797_v23, %v796_v22  ;;  %v798_v33 = vmul.f32 %v791_v8, %v769_v25 }
 0x170   : > { %v632_v34 = vpop.f32.mrf.mxu0  ;;  %v758_v35 = vpop.f32.mrf.mxu1  ;;  %v820_v36 = vmul.f32 %v797_v23, %v797_v23 }
 0x171   : > { %v799_v37 = vmul.f32 %v795_v13, %v770_v30  ;;  %v646_v38 = vadd.f32 %v632_v34, %v515_v28  ;;  %v771_v39 = vadd.f32 %v756_v27, %v645_v29  ;;  %805 = vadd.xlane.f32.xlu0 %v804_v31  ;;  %v821_v51 = vmul.f32 %v798_v33, %v798_v33 }
 0x172   : > { %v636_v42 = vpop.f32.mrf.mxu0  ;;  %v762_v43 = vpop.f32.mrf.mxu1  ;;  %v827_v47 = vadd.f32 %v820_v36, %v819_v40 }
 0x173   : > { %v647_v44 = vadd.f32 %v636_v42, %v519_v32  ;;  %v772_v45 = vadd.f32 %v758_v35, %v646_v38  ;;  %v807_v46 = vadd.f32 %v799_v37, %v798_v33  ;;  %v800_v48 = vmul.f32 %v791_v8, %v771_v39 }
 0x174   : > { %v638_v49 = vpop.f32.mrf.mxu0  ;;  %v764_v50 = vpop.f32.mrf.mxu1  ;;  %v822_v52 = vmul.f32 %v799_v37, %v799_v37 }
 0x175   : > { %v801_v53 = vmul.f32 %v795_v13, %v772_v45  ;;  %v648_v54 = vadd.f32 %v638_v49, %v521_v41  ;;  %v773_v55 = vadd.f32 %v762_v43, %v647_v44  ;;  %808 = vadd.xlane.f32.xlu1 %v807_v46  ;;  %828 = vadd.xlane.f32.xlu0 %v827_v47 }
 0x176   : > { %v830_v58 = vadd.f32 %v822_v52, %v821_v51  ;;  %v823_v62 = vmul.f32 %v800_v48, %v800_v48 }
 0x177   : > { %v774_v56 = vadd.f32 %v764_v50, %v648_v54  ;;  %v810_v57 = vadd.f32 %v801_v53, %v800_v48  ;;  %v824_v59 = vmul.f32 %v801_v53, %v801_v53  ;;  %v802_v60 = vmul.f32 %v791_v8, %v773_v55  ;;  %v842_v8 = vld [vmem:[%s1127_s4] sm:$0xff] }
 0x179   : > { %v803_v61 = vmul.f32 %v795_v13, %v774_v56  ;;  %811 = vadd.xlane.f32.xlu1 %v810_v57  ;;  %831 = vadd.xlane.f32.xlu0 %v830_v58  ;;  %v833_v0 = vadd.f32 %v824_v59, %v823_v62  ;;  %v825_v2 = vmul.f32 %v802_v60, %v802_v60 }
 0x17b   : > { %v813_v63 = vadd.f32 %v803_v61, %v802_v60  ;;  %v826_v1 = vmul.f32 %v803_v61, %v803_v61 }
 0x17d   : > { %814 = vadd.xlane.f32.xlu1 %v813_v63  ;;  %834 = vadd.xlane.f32.xlu0 %v833_v0  ;;  %v836_v3 = vadd.f32 %v826_v1, %v825_v2 }
 0x181   : > { %837 = vadd.xlane.f32.xlu0 %v836_v3 }
 0x1fa   : > { %v806_v4 = vpop.xlane.xlu0 %805 }
 0x1fe   : > { %v809_v5 = vpop.xlane.xlu1 %808  ;;  %v829_v6 = vpop.xlane.xlu0 %828 }
 0x1ff   : > { %v816_v10 = vadd.f32 %v809_v5, %v806_v4 }
 0x202   : > { %v812_v7 = vpop.xlane.xlu1 %811  ;;  %v832_v9 = vpop.xlane.xlu0 %831 }
 0x203   : > { %v817_v11 = vadd.f32 %v816_v10, %v812_v7  ;;  %v839_v14 = vadd.f32 %v832_v9, %v829_v6 }
 0x206   : > { %v815_v12 = vpop.xlane.xlu1 %814  ;;  %v835_v13 = vpop.xlane.xlu0 %834 }
 0x207   : > { %v818_v15 = vadd.f32 %v817_v11, %v815_v12  ;;  %v840_v17 = vadd.f32 %v839_v14, %v835_v13 }
 0x209   : > { %v843_v16 = vadd.f32 %v842_v8, %v818_v15 }
 0x20a   : > { %v838_v19 = vpop.xlane.xlu0 %837 }
 0x20b   : > { %845 = vst.msk [vmem:[%s1127_s4] sm:$0xff] %vm844_vm6, %v843_v16  ;;  %v841_v20 = vadd.f32 %v840_v17, %v838_v19 }
 0x20d   : > { %v847_v21 = vadd.f32 %v846_v18, %v841_v20 }
 0x20f   : > { %848 = vst.msk [vmem:[%s1128_s5] sm:$0xff] %vm844_vm6, %v847_v21 }
 0x210 PF: > { %s16_s18 = sadd.s32 1, %s985_s18  }
 0x211   : > { %p13_p7 = scmp.ge.s32.totalorder %s16_s18, 5  }
 0x213   :  { %15 = sbr.rel (!%p13_p7) target bundleno = 1 (0x1), region = 80 }

// kernel: deconv_block_sum_forward.3
= control target key start
LH: loop header
LB: loop body
LE: loop exit
PB: predicated region body
PF: predicated region fallthrough
CT: control target
= control target key end

     0   :  { %s1109_s18 = smov 0   ;;  %s1111_s19 = smov 0   ;;  %s1234_s0 = inlined_call_operand.vmem [shape: bf16[4,896], index: 0, kind: input, shape index: {}, may-alias: {0,1}]   ;;  %s1235_s1 = inlined_call_operand.vmem [shape: bf16[4,896], index: 1, kind: input, shape index: {}, may-alias: {0,1}]   ;;  %s1236_s2 = inlined_call_operand.vmem [shape: f32[32,16], index: 2, kind: input, shape index: {}]   ;;  %s1237_s3 = inlined_call_operand.vmem [shape: f32[8,1], index: 3, kind: input, shape index: {}]   ;;  %s1238_s4 = inlined_call_operand.vmem [shape: f32[8,1], index: 4, kind: input, shape index: {}]   ;;  %s1239_s5 = inlined_call_operand.vmem [shape: bf16[32,768], index: 5, kind: output, shape index: {}]  }
   0x1   :  { %s1113_s20 = smov 0  }
   0x2 LB: > { %s1122_s21 = sadd.s32 4294967295, %s1069_s20   ;;  %s1124_s22 = sadd.s32 1, %s1069_s20   ;;  %s1069_s20 = sphi %s1113_s20, %s1243_s20   ;;  %s1065_s19 = sphi %s1111_s19, %s1242_s19   ;;  %s1061_s18 = sphi %s1109_s18, %s1241_s18  }
   0x3   : > { %s138_s23 = ssub.s32 %s1069_s20, %s1124_s22  ;;  %s141_s24 = sadd.s32 1, %s1065_s19 }
   0x4   : > { %p139_p0 = scmp.eq.s32.totalorder %s138_s23, 0  ;;  %p151_p1 = scmp.ne.s32.totalorder %s1065_s19, %s1061_s18 }
   0x5   : > { %p152_p2 = scmp.eq.s32.totalorder %s1122_s21, 2  ;;  %p948_p3 = scmp.ge.s32.totalorder %s1069_s20, 1 }
   0x6   : > { %s1132_s25 = scalar_select %p139_p0, %s1065_s19, %s141_s24  }
   0x7   : > { %p1134_p4 = por %p152_p2, %p151_p1  ;;  %p213_p5 = scmp.lt.s32.totalorder %s1069_s20, 4 }
   0x9   : > { %p214_p6 = pnand %p948_p3, %p213_p5 }
   0xa   : > { %s950_s27 = sshll.u32 (!%p214_p6), %s1122_s21, 1  ;;  %s1071_s6 = smov (!%p214_p6), 124  }
   0xb   : > { %217 = sbr.rel (%p214_p6) target bundleno = 391 (0x187), region = 40  ;;  %p255_p7 = scmp.lt.s32.totalorder (!%p214_p6), %s950_s27, 6 }
   0xc   : > { %s992_s30 = sadd.s32 (!%p214_p6), 2, %s950_s27  ;;  %s1073_s23 = smov (!%p214_p6), 127  }
   0xd   : > { %p266_p8 = scmp.lt.s32.totalorder (!%p214_p6), %s992_s30, 6  ;;  %s1074_s24 = smov (!%p214_p6), 111  }
   0xe   : > { %s1075_s29 = smov (!%p214_p6), 120   ;;  %s1077_s7 = smov (!%p214_p6), 110  }
   0xf   : > { %s247_s11 = sand.u32 (!%p214_p6), 1, %s1061_s18  }
  0x10   : > { %v279_v0 = vld [vmem:[%s1236_s2] sm:$0xff]  ;;  %s1245_s27 = smov (!%p255_p7, %s950_s27), 6  ;;  %s1247_s30 = smov (!%p266_p8, %s992_s30), 6  ;;  %v280_v1 = vld [vmem:[%s1236_s2 + $0x8] sm:$0xff]  ;;  %v1072_v2 = vmov 0.0   ;;  %v282_v6 = vld [vmem:[%s1236_s2 + $0x18] sm:$0xff] }
  0x11   : > { %287 = vrot.lane.b32.xlu1 %v279_v0, %s1071_s6  ;;  %s951_s9 = sshll.u32 %s1245_s27, 1  ;;  %383 = vmatprep.mubr.f32.mxu0 %v1072_v2  ;;  %s953_s13 = sshll.u32 %s1247_s30, 1  ;;  %vm314_vm0 = vcmask 1043456   ;;  %vm305_vm1 = vcmask 31744   ;;  %v281_v10 = vld [vmem:[%s1236_s2 + $0x10] sm:$0xff]  ;;  %v1078_v11 = vmov 0  }
  0x12   : > { %484 = vmatprep.mubr.f32.mxu1 %v1072_v2  ;;  %s258_s12 = scalar_lea.vmem %s1234_s0, %s951_s9  ;;  %s269_s16 = scalar_lea.vmem %s1235_s1, %s953_s13  ;;  %1045 = vset.pattern.permute.xlu0 %v1078_v11  ;;  %v775_v12 = vld [vmem:[%s1238_s4] sm:$0xff]  ;;  %vm302_vm2 = vcmask 1039360   ;;  %vm523_vm3 = vcmask 908288   ;;  %vm649_vm4 = vcmask 900096  }
  0x13   : > { %v273_v3 = vld [vmem:[%s258_s12] sm:$0xf]  ;;  %s1076_s30 = smov 116   ;;  %1046 = vset.pattern.permute.xlu1 %v1078_v11  ;;  %s949_s12 = sshll.u32 %s247_s11, 5 }
  0x14   : > { %v274_v4 = vunpack.c.l.bf16 %v273_v3  ;;  %v275_v5 = vld [vmem:[%s269_s16] sm:$0x3]  ;;  %s1208_s18 = scalar_lea.vmem [#allocation2], %s949_s12  ;;  %s997_s13 = sshll.u32 (%p1134_p4), %s1122_s21, 3 }
  0x15   : > { %289 = vrot.lane.b32.xlu1 %v280_v1, %s1071_s6  ;;  %v276_v7 = vunpack.c.l.bf16 %v275_v5  ;;  %v761_v13 = vld [vmem:[%s1237_s3] sm:$0xff]  ;;  %s834_s16 = scalar_lea.vmem (%p1134_p4), %s1239_s5, %s997_s13 }
  0x16   : > { %v278_v8 = vcombine.high %v274_v4, %v274_v4 }
  0x18   : > { %v1030_v9 = vpack.i.bf16 %v276_v7, %v278_v8  ;;  %960 = vmatprep.subr.msk.mxu1 %vm314_vm0, %v278_v8 }
  0x19   : > { %293 = vrot.lane.b32.xlu1 %v282_v6, %s1071_s6  ;;  %961 = vmatpush1.msk.msra.mxu1 %vm314_vm0, %v274_v4 }
  0x1a   : > { %1031 = vrot.lane.b32.xlu0 %v1030_v9, %s1073_s23  ;;  %962 = vmatmul.mubr.msk.f32.vlgmr.msra.gmra.mxu1 %vm305_vm1, %v279_v0 }
  0x1b   : > { %490 = vmatprep.mubr.f32.mxu1 %v1072_v2 }
  0x1d   : > { %517 = vrot.lane.b32.xlu1 %v274_v4, %s1074_s24 }
  0x1e   : > { %296 = vrot.lane.b32.xlu0 %v274_v4, %s1073_s23  ;;  %963 = vmatmul.mubr.msk.f32.gmra.mxu1 %vm305_vm1, %v280_v1 }
  0x1f   : > { %496 = vmatprep.mubr.f32.mxu1 %v1072_v2 }
  0x21   : > { %509 = vrot.lane.b32.xlu1 %v279_v0, %s1075_s29 }
  0x22   : > { %291 = vrot.lane.b32.xlu0 %v281_v10, %s1071_s6  ;;  %964 = vmatmul.mubr.msk.f32.gmra.mxu1 %vm305_vm1, %v281_v10 }
  0x23   : > { %502 = vmatprep.mubr.f32.mxu1 %v1072_v2 }
  0x25   : > { %635 = vrot.lane.b32.xlu1 %v279_v0, %s1076_s30 }
  0x26   : > { %1036 = vrot.lane.b32.xlu0 %v1030_v9, %s1074_s24  ;;  %965 = vmatmul.mubr.msk.f32.gmra.mxu1 %vm305_vm1, %v282_v6 }
  0x27   : > { %728 = vmatprep.mubr.f32.mxu1 %v1072_v2 }
  0x29   : > { %637 = vrot.lane.b32.xlu1 %v280_v1, %s1076_s30 }
  0x2a   : > { %1041 = vrot.lane.b32.xlu0 %v1030_v9, %s1077_s7 }
  0x2d   : > { %639 = vrot.lane.b32.xlu1 %v281_v10, %s1076_s30 }
  0x2e   : > { %643 = vrot.lane.b32.xlu0 %v274_v4, %s1077_s7 }
  0x31   : > { %641 = vrot.lane.b32.xlu1 %v282_v6, %s1076_s30 }
  0x32   : > { %511 = vrot.lane.b32.xlu0 %v280_v1, %s1075_s29 }
  0x35   : > { %778 = vperm.xlu1 %1046, %v775_v12  }
  0x36   : > { %513 = vrot.lane.b32.xlu0 %v281_v10, %s1075_s29 }
  0x3a   : > { %515 = vrot.lane.b32.xlu0 %v282_v6, %s1075_s29 }
  0x3e   : > { %764 = vperm.xlu0 %1045, %v761_v13  }
  0x83   : > { %v288_v14 = vpop.permute.xlu1 %287 }
  0x87   : > { %v290_v15 = vpop.permute.xlu1 %289 }
  0x8b   : > { %v294_v16 = vpop.permute.xlu1 %293 }
  0x8c   : > { %v1032_v17 = vpop.permute.xlu0 %1031 }
  0x8d   : > { %v1034_v18 = vunpack.i.h.bf16 %v1032_v17  ;;  %v1033_v19 = vunpack.i.l.bf16 %v1032_v17 }
  0x8f   : > { %v518_v20 = vpop.permute.xlu1 %517  ;;  %v304_v21 = vsel %vm302_vm2, %v1033_v19, %v1034_v18 }
  0x90   : > { %v297_v22 = vpop.permute.xlu0 %296  ;;  %954 = vmatprep.subr.msk.mxu0 %vm314_vm0, %v304_v21 }
  0x91   : > { %v303_v23 = vsel %vm302_vm2, %v297_v22, %v1033_v19 }
  0x92   : > { %955 = vmatpush1.msk.msra.mxu0 %vm314_vm0, %v303_v23 }
  0x93   : > { %956 = vmatmul.mubr.msk.f32.vlgmr.msra.gmra.mxu0 %vm305_vm1, %v288_v14  ;;  %v510_v25 = vpop.permute.xlu1 %509 }
  0x94   : > { %v292_v24 = vpop.permute.xlu0 %291  ;;  %389 = vmatprep.mubr.f32.mxu0 %v1072_v2 }
  0x97   : > { %957 = vmatmul.mubr.msk.f32.gmra.mxu0 %vm305_vm1, %v290_v15  ;;  %v636_v29 = vpop.permute.xlu1 %635 }
  0x98   : > { %v1037_v26 = vpop.permute.xlu0 %1036  ;;  %395 = vmatprep.mubr.f32.mxu0 %v1072_v2 }
  0x99   : > { %v1039_v27 = vunpack.i.h.bf16 %v1037_v26  ;;  %v1038_v28 = vunpack.i.l.bf16 %v1037_v26 }
  0x9b   : > { %v524_v30 = vsel %vm523_vm3, %v518_v20, %v1038_v28  ;;  %958 = vmatmul.mubr.msk.f32.gmra.mxu0 %vm305_vm1, %v292_v24  ;;  %v525_v31 = vsel %vm523_vm3, %v1038_v28, %v1039_v27  ;;  %v638_v37 = vpop.permute.xlu1 %637 }
  0x9c   : > { %v1042_v32 = vpop.permute.xlu0 %1041  ;;  %966 = vmatprep.subr.msk.mxu0 %vm314_vm0, %v525_v31  ;;  %401 = vmatprep.mubr.f32.mxu0 %v1072_v2 }
  0x9d   : > { %v1044_v33 = vunpack.i.h.bf16 %v1042_v32  ;;  %v1043_v34 = vunpack.i.l.bf16 %v1042_v32  ;;  %967 = vmatpush1.msk.msra.mxu0 %vm314_vm0, %v524_v30 }
  0x9f   : > { %959 = vmatmul.mubr.msk.f32.gmra.mxu0 %vm305_vm1, %v294_v16  ;;  %v651_v35 = vsel %vm649_vm4, %v1043_v34, %v1044_v33  ;;  %v640_v40 = vpop.permute.xlu1 %639 }
  0xa0   : > { %v644_v36 = vpop.permute.xlu0 %643  ;;  %972 = vmatprep.subr.msk.mxu1 %vm314_vm0, %v651_v35  ;;  %602 = vmatprep.mubr.f32.mxu0 %v1072_v2 }
  0xa1   : > { %v650_v38 = vsel %vm649_vm4, %v644_v36, %v1043_v34 }
  0xa2   : > { %973 = vmatpush1.msk.msra.mxu1 %vm314_vm0, %v650_v38 }
  0xa3   : > { %968 = vmatmul.mubr.msk.f32.vlgmr.msra.gmra.mxu0 %vm305_vm1, %v510_v25  ;;  %974 = vmatmul.mubr.msk.f32.vlgmr.msra.gmra.mxu1 %vm305_vm1, %v636_v29  ;;  %v642_v43 = vpop.permute.xlu1 %641 }
  0xa4   : > { %v512_v39 = vpop.permute.xlu0 %511  ;;  %608 = vmatprep.mubr.f32.mxu0 %v1072_v2  ;;  %734 = vmatprep.mubr.f32.mxu1 %v1072_v2 }
  0xa7   : > { %969 = vmatmul.mubr.msk.f32.gmra.mxu0 %vm305_vm1, %v512_v39  ;;  %975 = vmatmul.mubr.msk.f32.gmra.mxu1 %vm305_vm1, %v638_v37 }
  0xa8   : > { %v514_v41 = vpop.permute.xlu0 %513  ;;  %614 = vmatprep.mubr.f32.mxu0 %v1072_v2  ;;  %740 = vmatprep.mubr.f32.mxu1 %v1072_v2 }
  0xab   : > { %970 = vmatmul.mubr.msk.f32.gmra.mxu0 %vm305_vm1, %v514_v41  ;;  %976 = vmatmul.mubr.msk.f32.gmra.mxu1 %vm305_vm1, %v640_v40 }
  0xac   : > { %v516_v42 = vpop.permute.xlu0 %515  ;;  %620 = vmatprep.mubr.f32.mxu0 %v1072_v2  ;;  %746 = vmatprep.mubr.f32.mxu1 %v1072_v2 }
  0xaf   : > { %971 = vmatmul.mubr.msk.f32.gmra.mxu0 %vm305_vm1, %v516_v42  ;;  %977 = vmatmul.mubr.msk.f32.gmra.mxu1 %vm305_vm1, %v642_v43 }
  0xb0   : > { %v779_v7 = vpop.permute.xlu1 %778 }
  0xb9   : > { %v765_v1 = vpop.permute.xlu0 %764 }
  0xda   : > { %v486_v44 = vpop.f32.mrf.mxu1 }
  0xdc   : > { %v488_v45 = vpop.f32.mrf.mxu1 }
  0xde   : > { %v492_v46 = vpop.f32.mrf.mxu1 }
  0xe0   : > { %v494_v47 = vpop.f32.mrf.mxu1 }
  0xe2   : > { %v498_v49 = vpop.f32.mrf.mxu1 }
  0xe4   : > { %v500_v52 = vpop.f32.mrf.mxu1 }
  0xe6   : > { %v504_v55 = vpop.f32.mrf.mxu1 }
  0xe8   : > { %v506_v58 = vpop.f32.mrf.mxu1 }
 0x153   : > { %v385_v48 = vpop.f32.mrf.mxu0 }
 0x154   : > { %v487_v60 = vadd.f32 %v486_v44, %v385_v48 }
 0x155   : > { %v387_v50 = vpop.f32.mrf.mxu0 }
 0x156   : > { %v489_v63 = vadd.f32 %v488_v45, %v387_v50 }
 0x157   : > { %v391_v51 = vpop.f32.mrf.mxu0 }
 0x158   : > { %v493_v4 = vadd.f32 %v492_v46, %v391_v51 }
 0x159   : > { %v393_v53 = vpop.f32.mrf.mxu0 }
 0x15a   : > { %v495_v10 = vadd.f32 %v494_v47, %v393_v53 }
 0x15b   : > { %v397_v54 = vpop.f32.mrf.mxu0 }
 0x15c   : > { %v499_v14 = vadd.f32 %v498_v49, %v397_v54 }
 0x15d   : > { %v399_v56 = vpop.f32.mrf.mxu0 }
 0x15e   : > { %v501_v23 = vadd.f32 %v500_v52, %v399_v56 }
 0x15f   : > { %v403_v57 = vpop.f32.mrf.mxu0 }
 0x160   : > { %v505_v27 = vadd.f32 %v504_v55, %v403_v57 }
 0x161   : > { %v405_v59 = vpop.f32.mrf.mxu0 }
 0x162   : > { %v507_v39 = vadd.f32 %v506_v58, %v405_v59 }
 0x163   : > { %v604_v61 = vpop.f32.mrf.mxu0  ;;  %v730_v62 = vpop.f32.mrf.mxu1 }
 0x164   : > { %v627_v0 = vadd.f32 %v604_v61, %v487_v60 }
 0x165   : > { %v606_v2 = vpop.f32.mrf.mxu0  ;;  %v732_v3 = vpop.f32.mrf.mxu1 }
 0x166   : > { %v628_v5 = vadd.f32 %v606_v2, %v489_v63  ;;  %v753_v6 = vadd.f32 %v730_v62, %v627_v0 }
 0x167   : > { %v610_v8 = vpop.f32.mrf.mxu0  ;;  %v736_v9 = vpop.f32.mrf.mxu1 }
 0x168   : > { %v767_v11 = vmul.f32 %v765_v1, %v753_v6  ;;  %v629_v12 = vadd.f32 %v610_v8, %v493_v4  ;;  %v754_v13 = vadd.f32 %v732_v3, %v628_v5 }
 0x169   : > { %v612_v15 = vpop.f32.mrf.mxu0  ;;  %v738_v16 = vpop.f32.mrf.mxu1 }
 0x16a   : > { %v768_v17 = vmul.f32 %v765_v1, %v754_v13  ;;  %v781_v18 = vadd.f32 %v779_v7, %v767_v11  ;;  %v630_v19 = vadd.f32 %v612_v15, %v495_v10  ;;  %v755_v20 = vadd.f32 %v736_v9, %v629_v12 }
 0x16b   : > { %v616_v21 = vpop.f32.mrf.mxu0  ;;  %v742_v22 = vpop.f32.mrf.mxu1 }
 0x16c   : > { %v782_v24 = vadd.f32 %v779_v7, %v768_v17  ;;  %v769_v25 = vmul.f32 %v765_v1, %v755_v20  ;;  %v631_v26 = vadd.f32 %v616_v21, %v499_v14  ;;  %v756_v28 = vadd.f32 %v738_v16, %v630_v19 }
 0x16d   : > { %v618_v29 = vpop.f32.mrf.mxu0  ;;  %v744_v30 = vpop.f32.mrf.mxu1  ;;  %v789_v31 = vmax.f32 %v781_v18, 0.0 }
 0x16e   : > { %v790_v32 = vmax.f32 %v782_v24, 0.0  ;;  %v632_v33 = vadd.f32 %v618_v29, %v501_v23  ;;  %v757_v34 = vadd.f32 %v742_v22, %v631_v26  ;;  %v783_v35 = vadd.f32 %v779_v7, %v769_v25 }
 0x16f   : > { %v770_v36 = vmul.f32 %v765_v1, %v756_v28  ;;  %v622_v37 = vpop.f32.mrf.mxu0  ;;  %v748_v38 = vpop.f32.mrf.mxu1 }
 0x170   : > { %v993_v40 = vpack.c.bf16 %v790_v32, %v789_v31  ;;  %v771_v41 = vmul.f32 %v765_v1, %v757_v34  ;;  %v633_v42 = vadd.f32 %v622_v37, %v505_v27  ;;  %v758_v44 = vadd.f32 %v744_v30, %v632_v33 }
 0x171   : > { %v784_v43 = vadd.f32 %v779_v7, %v770_v36  ;;  %v624_v45 = vpop.f32.mrf.mxu0  ;;  %v791_v48 = vmax.f32 %v783_v35, 0.0  ;;  %v750_v52 = vpop.f32.mrf.mxu1 }
 0x172   : > { %821 = vst [vmem:[%s1208_s18] sm:$0xff] %v993_v40  ;;  %v634_v46 = vadd.f32 %v624_v45, %v507_v39  ;;  %v759_v47 = vadd.f32 %v748_v38, %v633_v42  ;;  %v785_v50 = vadd.f32 %v779_v7, %v771_v41  ;;  %v772_v51 = vmul.f32 %v765_v1, %v758_v44 }
 0x173   : > { %v792_v49 = vmax.f32 %v784_v43, 0.0 }
 0x174   : > { %v773_v53 = vmul.f32 %v765_v1, %v759_v47  ;;  %v760_v54 = vadd.f32 %v750_v52, %v634_v46  ;;  %v786_v56 = vadd.f32 %v779_v7, %v772_v51  ;;  %v793_v59 = vmax.f32 %v785_v50, 0.0 }
 0x175   : > { %v994_v55 = vpack.c.bf16 %v792_v49, %v791_v48 }
 0x176   : > { %v787_v57 = vadd.f32 %v779_v7, %v773_v53  ;;  %v774_v58 = vmul.f32 %v765_v1, %v760_v54  ;;  %v794_v60 = vmax.f32 %v786_v56, 0.0 }
 0x177   : > { %822 = vst [vmem:[%s1208_s18 + $0x8] sm:$0xff] %v994_v55 }
 0x178   : > { %v788_v61 = vadd.f32 %v779_v7, %v774_v58  ;;  %v995_v62 = vpack.c.bf16 %v794_v60, %v793_v59  ;;  %v795_v63 = vmax.f32 %v787_v57, 0.0 }
 0x179   : > { %v869_v1 = vld [vmem:[%s1208_s18] sm:$0xff] (%p1134_p4) }
 0x17a   : > { %v796_v0 = vmax.f32 %v788_v61, 0.0  ;;  %823 = vst [vmem:[%s1208_s18 + $0x10] sm:$0xff] %v995_v62  ;;  %831 = sbr.rel (!%p1134_p4) target bundleno = 391 (0x187), region = 44  ;;  %870 = vst [vmem:[%s834_s16] sm:$0xff] (%p1134_p4), %v869_v1 }
 0x17c   : > { %v996_v2 = vpack.c.bf16 %v796_v0, %v795_v63 }
 0x17e   : > { %824 = vst [vmem:[%s1208_s18 + $0x18] sm:$0xff] %v996_v2  ;;  %v871_v3 = vld [vmem:[%s1208_s18 + $0x8] sm:$0xff] (%p1134_p4) }
 0x17f   : > { %872 = vst [vmem:[%s834_s16 + $0x18] sm:$0xff] %v871_v3 }
 0x181   : > { %v873_v4 = vld [vmem:[%s1208_s18 + $0x10] sm:$0xff] }
 0x182   : > { %874 = vst [vmem:[%s834_s16 + $0x30] sm:$0xff] %v873_v4 }
 0x185   : > { %v875_v5 = vld [vmem:[%s1208_s18 + $0x18] sm:$0xff] }
 0x186   : > { %876 = vst [vmem:[%s834_s16 + $0x48] sm:$0xff] %v875_v5 }
 0x187 PF: > { %p12_p9 = scmp.ge.s32.totalorder %s1124_s22, 5   ;;  %s1241_s18 = smov %s1065_s19 }
 0x188   : > { %s1242_s19 = smov %s1132_s25  ;;  %s1243_s20 = smov %s1124_s22 }
 0x189   :  { %14 = sbr.rel (!%p12_p9) target bundleno = 2 (0x2), region = 111 }

</bundles_post_ra>
